<compile_context>
chip_gen: v5e
topology: v5e:2x2
jax: 0.10.0
libtpu: 0.0.40
codegen_flags: <defaults>
</compile_context>

<pallas_src>
import functools

import jax
import jax.numpy as jnp
from jax.experimental import pallas as pl
from jax.experimental.pallas import tpu as pltpu


def _physical_vmem_bytes():
    """Best-effort physical VMEM size of the attached TPU (bytes)."""
    try:
        return int(pltpu.get_tpu_info().vmem_capacity_bytes)
    except Exception:
        pass
    try:
        kind = jax.devices()[0].device_kind.lower()
    except Exception:
        kind = ""
    if "v7" in kind:
        return 64 << 20          # v7x: 64 MiB per TensorCore
    if "v5" in kind or "v6" in kind:
        return 128 << 20         # v5e / v6e: 128 MiB
    return 64 << 20              # unknown: be conservative


def _select_tiling(n, c, hw, act_itemsize, param_itemsize, vmem_physical):
    """Pick (t_hw, nb, vmem_limit_bytes) from an explicit VMEM budget.

    Per-step VMEM footprint ~= 2 (double buffer) * 3 (q, v, out) * nb * c * t_hw
    * act_itemsize, plus the resident weight/bias.
    """
    param_bytes = (c * c + c) * param_itemsize
    budget = int(vmem_physical * 0.55)          # headroom for scratch/semaphores
    per_lane = 6 * c * act_itemsize             # bytes of tile traffic per spatial lane
    min_lanes = hw if hw < 128 else 128
    avail = max(budget - 2 * param_bytes, per_lane * min_lanes)

    if hw * per_lane <= avail:
        # Whole spatial extent fits: spend the remaining budget packing batch rows
        # into the block (one contiguous HBM slab per step, fewer grid steps).
        t_hw = hw
        nb = max(1, min(n, avail // (hw * per_lane)))
    else:
        # Lane-dense 128-multiple tile as large as the budget allows.
        t_hw = max(128, (avail // per_lane) // 128 * 128)
        nb = 1

    footprint = 6 * nb * c * t_hw * act_itemsize + 2 * param_bytes
    vmem_limit = min(int(vmem_physical * 0.9), footprint + (8 << 20))
    vmem_limit = max(vmem_limit, 16 << 20)
    return int(t_hw), int(nb), int(vmem_limit)


def _conv1x1_add_kernel(q_ref, v_ref, w_ref, b_ref, o_ref, *,
                        use_mxu, mxu_bf16, batched):
    # q/v/o refs: (C, T) if not batched else (NB, C, T); w: (Cout, Cin); b: (C, 1)
    q = q_ref[...]
    v = v_ref[...]
    w = w_ref[...]
    b = b_ref[...].astype(jnp.float32)

    if use_mxu:
        # Channel matmul on the MXU. bf16 inputs + f32 accumulation avoid the
        # multi-pass f32 MXU emulation and are harmless while HBM-bound.
        wk = w.astype(jnp.bfloat16) if mxu_bf16 else w.astype(jnp.float32)
        vk = v.astype(jnp.bfloat16) if mxu_bf16 else v.astype(jnp.float32)
        if batched:
            y = jnp.einsum("oc,bct->bot", wk, vk,
                           preferred_element_type=jnp.float32)
        else:
            y = jnp.dot(wk, vk, preferred_element_type=jnp.float32)
    else:
        # Small C: a K=C matmul would use a sliver of the systolic array; do C
        # VPU fused multiply-adds instead, spread over up to 4 independent partial
        # accumulators to break the serial VALU dependency chain.
        w32 = w.astype(jnp.float32)
        v32 = v.astype(jnp.float32)
        c_in = w32.shape[1]

        def term(i):
            if batched:
                return w32[None, :, i:i + 1] * v32[:, i:i + 1, :]   # (NB, Cout, T)
            return w32[:, i:i + 1] * v32[i:i + 1, :]                # (Cout, T)

        n_acc = min(4, c_in)
        parts = [term(i) for i in range(n_acc)]
        for i in range(n_acc, c_in):
            parts[i % n_acc] = parts[i % n_acc] + term(i)
        y = parts[0]
        for p in parts[1:]:
            y = y + p

    if batched:
        b = b[None]              # (1, C, 1): broadcasts over batch rows and lanes
    o_ref[...] = (q.astype(jnp.float32) + y + b).astype(o_ref.dtype)


def conv1x1_forward(q, v, weight, bias, *, mxu_min_channels=64,
                    mxu_bf16_inputs=True, alias_q_to_out=False):
    """q, v: (N, C, H, W); weight: (C, C, 1, 1); bias: (C,). Returns q + conv1x1(v)."""
    N, C, H, W = q.shape
    HW = H * W

    # Pure reshapes (contiguous) -- no HBM data movement.
    q3 = q.reshape(N, C, HW)
    v3 = v.reshape(N, C, HW)
    w2 = weight.reshape(C, C)          # (Cout, Cin)
    b2 = bias.reshape(C, 1)            # broadcasts along the lane (spatial) dim

    act_itemsize = jnp.dtype(q.dtype).itemsize
    param_itemsize = jnp.dtype(weight.dtype).itemsize
    t_hw, nb, vmem_limit = _select_tiling(N, C, HW, act_itemsize, param_itemsize,
                                          _physical_vmem_bytes())

    n_t = pl.cdiv(HW, t_hw)            # spatial tiles
    n_b = pl.cdiv(N, nb)               # batch blocks

    # Both grid axes are fully independent; put the larger one first so the two
    # v7x TensorCores stay balanced even for N == 1 / odd N.
    if n_t >= n_b:
        grid = (n_t, n_b)
        qvo_map = lambda t, n: (n, 0, t)
    else:
        grid = (n_b, n_t)
        qvo_map = lambda n, t: (n, 0, t)
    const_map = lambda i, j: (0, 0)

    batched = nb > 1
    lead = nb if batched else pl.Squeezed()
    act_block = (lead, C, t_hw)

    def _resident_spec(block_shape, index_map):
        # Constant index map => fetched once; single-buffer it to save C^2*itemsize
        # of VMEM (matters under v7x's 64 MiB). Fall back gracefully if this JAX
        # version does not expose pipeline_mode.
        try:
            return pl.BlockSpec(block_shape, index_map,
                                pipeline_mode=pl.Buffered(1))
        except (TypeError, AttributeError):
            return pl.BlockSpec(block_shape, index_map)

    use_mxu = C >= mxu_min_channels
    kernel = functools.partial(_conv1x1_add_kernel, use_mxu=use_mxu,
                               mxu_bf16=mxu_bf16_inputs, batched=batched)

    cost = pl.CostEstimate(
        flops=2 * N * HW * C * C + 2 * N * C * HW,
        transcendentals=0,
        bytes_accessed=3 * N * C * HW * act_itemsize + (C * C + C) * param_itemsize,
    )

    call_kwargs = {}
    if alias_q_to_out:
        # q is input 0 of the pallas_call; reuse its HBM buffer for the output
        # (caller must not use q afterwards / should donate it at the jit boundary).
        call_kwargs["input_output_aliases"] = {0: 0}

    out3 = pl.pallas_call(
        kernel,
        out_shape=jax.ShapeDtypeStruct((N, C, HW), q.dtype),
        grid_spec=pltpu.PrefetchScalarGridSpec(
            num_scalar_prefetch=0,
            grid=grid,
            in_specs=[
                pl.BlockSpec(act_block, qvo_map),        # q tile
                pl.BlockSpec(act_block, qvo_map),        # v tile
                _resident_spec((C, C), const_map),       # W, resident
                _resident_spec((C, 1), const_map),       # bias, resident
            ],
            out_specs=pl.BlockSpec(act_block, qvo_map),
        ),
        compiler_params=pltpu.CompilerParams(
            dimension_semantics=("parallel", "parallel"),
            vmem_limit_bytes=vmem_limit,
        ),
        cost_estimate=cost,
        **call_kwargs,
    )(q3, v3, w2, b2)

    return out3.reshape(N, C, H, W)


if __name__ == "__main__":
    key = jax.random.PRNGKey(0)
    k_q, k_v, k_w, k_b = jax.random.split(key, 4)

    N, C, H, Wd = 2, 4, 16, 16
    q = jax.random.normal(k_q, (N, C, H, Wd), dtype=jnp.float32)
    v = jax.random.normal(k_v, (N, C, H, Wd), dtype=jnp.float32)

    # Deterministic synthetic parameters (same shapes as nn.Conv2d(C, C, 1))
    weight = jax.random.normal(k_w, (C, C, 1, 1), dtype=jnp.float32) * 0.1
    bias = jax.random.normal(k_b, (C,), dtype=jnp.float32) * 0.1

    out = conv1x1_forward(q, v, weight, bias)
    out = jax.block_until_ready(out)

    # Reference check in plain JAX (1x1 conv == einsum over channels + bias)
    ref = (q + jnp.einsum("oi,nihw->nohw", weight.reshape(C, C), v)
           + bias[None, :, None, None])
    assert jnp.allclose(out, ref, atol=1e-5, rtol=1e-5), "mismatch vs reference"

    print("KERNEL_OK")
</pallas_src>

<mosaic_0001>
module attributes {stable_mosaic.version = 11 : i64} {
  func.func @_conv1x1_add_kernel(%arg0: i32, %arg1: i32, %arg2: memref<2x4x256xf32, #tpu.memory_space<vmem>>, %arg3: memref<2x4x256xf32, #tpu.memory_space<vmem>>, %arg4: memref<4x4xf32, #tpu.memory_space<vmem>>, %arg5: memref<4x1xf32, #tpu.memory_space<vmem>>, %arg6: memref<2x4x256xf32, #tpu.memory_space<vmem>>) attributes {dimension_semantics = [#tpu.dimension_semantics<parallel>, #tpu.dimension_semantics<parallel>], iteration_bounds = array<i64: 1, 1>, scalar_prefetch = 0 : i64, scratch_operands = 0 : i64, tpu.core_type = #tpu.core_type<tc>, window_params = [{transform_indices = @transform_0, window_bounds = array<i64: 2, 4, 256>}, {transform_indices = @transform_1, window_bounds = array<i64: 2, 4, 256>}, {pipeline_mode = #tpu.pipeline_mode<synchronous>, transform_indices = @transform_2, window_bounds = array<i64: 4, 4>}, {pipeline_mode = #tpu.pipeline_mode<synchronous>, transform_indices = @transform_3, window_bounds = array<i64: 4, 1>}, {transform_indices = @transform_4, window_bounds = array<i64: 2, 4, 256>}]} {
    %c0 = arith.constant 0 : index
    %c0_0 = arith.constant 0 : index
    %c0_1 = arith.constant 0 : index
    %0 = vector.load %arg2[%c0, %c0_0, %c0_1] : memref<2x4x256xf32, #tpu.memory_space<vmem>>, vector<2x4x256xf32>
    %c0_2 = arith.constant 0 : index
    %c0_3 = arith.constant 0 : index
    %c0_4 = arith.constant 0 : index
    %1 = vector.load %arg3[%c0_2, %c0_3, %c0_4] : memref<2x4x256xf32, #tpu.memory_space<vmem>>, vector<2x4x256xf32>
    %c0_5 = arith.constant 0 : index
    %c0_6 = arith.constant 0 : index
    %2 = vector.load %arg4[%c0_5, %c0_6] : memref<4x4xf32, #tpu.memory_space<vmem>>, vector<4x4xf32>
    %c0_7 = arith.constant 0 : index
    %c0_8 = arith.constant 0 : index
    %3 = vector.load %arg5[%c0_7, %c0_8] : memref<4x1xf32, #tpu.memory_space<vmem>>, vector<4x1xf32>
    %4 = vector.extract_strided_slice %2 {offsets = [0, 0], sizes = [4, 1], strides = [1, 1]} : vector<4x4xf32> to vector<4x1xf32>
    %5 = vector.shape_cast %4 : vector<4x1xf32> to vector<1x4x1xf32>
    %6 = vector.extract_strided_slice %1 {offsets = [0, 0, 0], sizes = [2, 1, 256], strides = [1, 1, 1]} : vector<2x4x256xf32> to vector<2x1x256xf32>
    %7 = vector.broadcast %5 : vector<1x4x1xf32> to vector<2x4x256xf32>
    %8 = vector.broadcast %6 : vector<2x1x256xf32> to vector<2x4x256xf32>
    %9 = arith.mulf %7, %8 : vector<2x4x256xf32>
    %10 = vector.extract_strided_slice %2 {offsets = [0, 1], sizes = [4, 1], strides = [1, 1]} : vector<4x4xf32> to vector<4x1xf32>
    %11 = vector.shape_cast %10 : vector<4x1xf32> to vector<1x4x1xf32>
    %12 = vector.extract_strided_slice %1 {offsets = [0, 1, 0], sizes = [2, 1, 256], strides = [1, 1, 1]} : vector<2x4x256xf32> to vector<2x1x256xf32>
    %13 = vector.broadcast %11 : vector<1x4x1xf32> to vector<2x4x256xf32>
    %14 = vector.broadcast %12 : vector<2x1x256xf32> to vector<2x4x256xf32>
    %15 = arith.mulf %13, %14 : vector<2x4x256xf32>
    %16 = vector.extract_strided_slice %2 {offsets = [0, 2], sizes = [4, 1], strides = [1, 1]} : vector<4x4xf32> to vector<4x1xf32>
    %17 = vector.shape_cast %16 : vector<4x1xf32> to vector<1x4x1xf32>
    %18 = vector.extract_strided_slice %1 {offsets = [0, 2, 0], sizes = [2, 1, 256], strides = [1, 1, 1]} : vector<2x4x256xf32> to vector<2x1x256xf32>
    %19 = vector.broadcast %17 : vector<1x4x1xf32> to vector<2x4x256xf32>
    %20 = vector.broadcast %18 : vector<2x1x256xf32> to vector<2x4x256xf32>
    %21 = arith.mulf %19, %20 : vector<2x4x256xf32>
    %22 = vector.extract_strided_slice %2 {offsets = [0, 3], sizes = [4, 1], strides = [1, 1]} : vector<4x4xf32> to vector<4x1xf32>
    %23 = vector.shape_cast %22 : vector<4x1xf32> to vector<1x4x1xf32>
    %24 = vector.extract_strided_slice %1 {offsets = [0, 3, 0], sizes = [2, 1, 256], strides = [1, 1, 1]} : vector<2x4x256xf32> to vector<2x1x256xf32>
    %25 = vector.broadcast %23 : vector<1x4x1xf32> to vector<2x4x256xf32>
    %26 = vector.broadcast %24 : vector<2x1x256xf32> to vector<2x4x256xf32>
    %27 = arith.mulf %25, %26 : vector<2x4x256xf32>
    %28 = arith.addf %9, %15 : vector<2x4x256xf32>
    %29 = arith.addf %28, %21 : vector<2x4x256xf32>
    %30 = arith.addf %29, %27 : vector<2x4x256xf32>
    %31 = vector.shape_cast %3 : vector<4x1xf32> to vector<1x4x1xf32>
    %32 = arith.addf %0, %30 : vector<2x4x256xf32>
    %33 = vector.broadcast %31 : vector<1x4x1xf32> to vector<2x4x256xf32>
    %34 = arith.addf %32, %33 : vector<2x4x256xf32>
    %c0_9 = arith.constant 0 : index
    %c0_10 = arith.constant 0 : index
    %c0_11 = arith.constant 0 : index
    %35 = vector.load %arg6[%c0_9, %c0_10, %c0_11] : memref<2x4x256xf32, #tpu.memory_space<vmem>>, vector<2x4x256xf32>
    tpu.vector_store %arg6[%c0_9, %c0_10, %c0_11], %34 {strides = array<i32>} : memref<2x4x256xf32, #tpu.memory_space<vmem>>, vector<2x4x256xf32>,
    return
  }
  func.func @transform_0(%arg0: i32, %arg1: i32) -> (i32, i32, i32) {
    %c0_i32 = arith.constant 0 : i32
    %c0_i32_0 = arith.constant 0 : i32
    return %arg1, %c0_i32, %arg0 : i32, i32, i32
  }
  func.func @transform_1(%arg0: i32, %arg1: i32) -> (i32, i32, i32) {
    %c0_i32 = arith.constant 0 : i32
    %c0_i32_0 = arith.constant 0 : i32
    return %arg1, %c0_i32, %arg0 : i32, i32, i32
  }
  func.func @transform_2(%arg0: i32, %arg1: i32) -> (i32, i32) {
    %c0_i32 = arith.constant 0 : i32
    %c0_i32_0 = arith.constant 0 : i32
    %c0_i32_1 = arith.constant 0 : i32
    return %c0_i32, %c0_i32_0 : i32, i32
  }
  func.func @transform_3(%arg0: i32, %arg1: i32) -> (i32, i32) {
    %c0_i32 = arith.constant 0 : i32
    %c0_i32_0 = arith.constant 0 : i32
    %c0_i32_1 = arith.constant 0 : i32
    return %c0_i32, %c0_i32_0 : i32, i32
  }
  func.func @transform_4(%arg0: i32, %arg1: i32) -> (i32, i32, i32) {
    %c0_i32 = arith.constant 0 : i32
    %c0_i32_0 = arith.constant 0 : i32
    return %arg1, %c0_i32, %arg0 : i32, i32, i32
  }
}

</mosaic_0001>

<bundles_post_ra>
// kernel: tpu_custom_call.1
= control target key start
LH: loop header
LB: loop body
LE: loop exit
PB: predicated region body
PF: predicated region fallthrough
CT: control target
= control target key end

     0   :  { %9 = vsyncpa [#allocation3], 0  ;;  %s350_s0 = inlined_call_operand.hbm [shape: f32[2,4,256], index: 0, kind: input, shape index: {}]   ;;  %s351_s1 = inlined_call_operand.hbm [shape: f32[2,4,256], index: 1, kind: input, shape index: {}]   ;;  %s352_s2 = inlined_call_operand.vmem [shape: f32[4,4], index: 2, kind: input, shape index: {}]   ;;  %s353_s3 = inlined_call_operand.vmem [shape: f32[4,1], index: 3, kind: input, shape index: {}]   ;;  %s354_s4 = inlined_call_operand.hbm [shape: f32[2,4,256], index: 4, kind: output, shape index: {}]  }
   0x1   :  { %10 = vsyncpa [#allocation6], 0 }
   0x2   :  { %11 = vsyncpa [#allocation4], 0  ;;  %s16_s17 = sshll.u32 %s350_s0, 4  ;;  %s291_s18 = smov [#allocation2]   ;;  %s17_s17 = int_to_ptr.hbm [resolvable:$true] %s16_s17 }
   0x3   :  { %s18_s19 = sshll.u32 %s291_s18, 4  ;;  %s29_s22 = sshll.u32 %s351_s1, 4  ;;  %s19_s19 = int_to_ptr.vmem [resolvable:$true] %s18_s19  ;;  %s30_s22 = int_to_ptr.hbm [resolvable:$true] %s29_s22 }
   0x4   :  { %s292_s23 = smov 128   ;;  %s293_s24 = smov 8  }
   0x5   :  { %24 = dma.hbm_to_vmem [thread:$0]  %s17_s17, 256, %s19_s19, [#allocation3], %s292_s23, %s292_s23, %s293_s24  }
   0x6   :  { %s294_s25 = smov [#allocation5]  }
   0x7   :  { %s31_s26 = sshll.u32 %s294_s25, 4  ;;  %s32_s26 = int_to_ptr.vmem [resolvable:$true] %s31_s26 }
   0x8   :  { %37 = dma.hbm_to_vmem [thread:$0]  %s30_s22, 256, %s32_s26, [#allocation6], %s292_s23, %s292_s23, %s293_s24  }
   0x9   :  { %285 = dma.done.wait [#allocation3], 256  }
   0xa   :  { %286 = vsyncadd [#allocation3], 4294967040 }
   0xb   :  { %287 = dma.done.wait [#allocation6], 256  }
   0xc   :  { %288 = vsyncadd [#allocation6], 4294967040  ;;  %v295_v0 = vmov 0   ;;  %v296_v1 = vmov 2   ;;  %v54_v2 = vld [vmem:[%s352_s2] sm:$0xf] }
   0xd   :  { %207 = vset.pattern.permute.xlu0 %v295_v0  ;;  %209 = vset.pattern.permute.xlu1 %v296_v1  ;;  %v55_v3 = vld [vmem:[%s353_s3] sm:$0xf]  ;;  %v297_v4 = vmov 1   ;;  %v298_v5 = vmov 3   ;;  %v52_v6 = vld [vmem:[#allocation5] sm:$0xff]  ;;  %v53_v7 = vld [vmem:[#allocation5 + $0x8] sm:$0xff] }
   0xe   :  { %211 = vset.pattern.permute.xlu2 %v295_v0  ;;  %58 = vperm.xlu0 %207, %v54_v2   ;;  %v63_v8 = vperm.slane %v52_v6, 0  ;;  %v64_v10 = vperm.slane %v52_v6, 4  ;;  %v65_v11 = vperm.slane %v53_v7, 0  ;;  %v66_v12 = vperm.slane %v53_v7, 4  ;;  %s300_s2 = smov [#allocation7]   ;;  %s183_s5 = sshll.u32 %s354_s4, 4  ;;  %s184_s5 = int_to_ptr.hbm [resolvable:$true] %s183_s5 }
   0xf   :  { %100 = vperm.xlu1 %209, %v54_v2   ;;  %166 = vperm.xlu2 %211, %v55_v3   ;;  %v103_v15 = vperm.slane %v52_v6, 2  ;;  %v104_v16 = vperm.slane %v52_v6, 6  ;;  %v105_v17 = vperm.slane %v53_v7, 2  ;;  %v83_v18 = vperm.slane %v52_v6, 1  ;;  %s181_s3 = sshll.u32 %s300_s2, 4  ;;  %s182_s3 = int_to_ptr.vmem [resolvable:$true] %s181_s3 }
  0x10   :  { %v71_v14 = vperm.slane %v63_v8, 0  ;;  %v84_v19 = vperm.slane %v52_v6, 5  ;;  %v85_v20 = vperm.slane %v53_v7, 1  ;;  %v86_v21 = vperm.slane %v53_v7, 5 }
  0x11   :  { %v106_v22 = vperm.slane %v53_v7, 6  ;;  %v123_v23 = vperm.slane %v52_v6, 3  ;;  %v124_v24 = vperm.slane %v52_v6, 7  ;;  %v126_v25 = vperm.slane %v53_v7, 7 }
  0x12   :  { %v72_v26 = vperm.slane %v64_v10, 0  ;;  %v73_v27 = vperm.slane %v65_v11, 0  ;;  %v74_v28 = vperm.slane %v66_v12, 0  ;;  %v125_v29 = vperm.slane %v53_v7, 3 }
  0x13   :  { %v111_v30 = vperm.slane %v103_v15, 2  ;;  %v112_v31 = vperm.slane %v104_v16, 2  ;;  %v113_v32 = vperm.slane %v105_v17, 2  ;;  %v91_v33 = vperm.slane %v83_v18, 1  ;;  %v51_v15 = vld [vmem:[#allocation2 + $0x8] sm:$0xff] }
  0x14   :  { %v92_v34 = vperm.slane %v84_v19, 1  ;;  %v93_v35 = vperm.slane %v85_v20, 1  ;;  %v94_v36 = vperm.slane %v86_v21, 1  ;;  %v114_v37 = vperm.slane %v106_v22, 2 }
  0x15   :  { %v131_v38 = vperm.slane %v123_v23, 3  ;;  %v132_v39 = vperm.slane %v124_v24, 3  ;;  %v134_v40 = vperm.slane %v126_v25, 3  ;;  %v133_v43 = vperm.slane %v125_v29, 3 }
  0x16   :  { %208 = vset.pattern.permute.xlu0 %v297_v4  ;;  %v299_v44 = vmov 839922192   ;;  %vm157_vm0 = vcmask 1043456  }
  0x17   :  { %210 = vset.pattern.permute.xlu1 %v298_v5  ;;  %80 = vperm.xlu0 %208, %v54_v2   ;;  %v169_v45 = vunpack.c.l.s4 %v299_v44 }
  0x18   :  { %120 = vperm.xlu1 %210, %v54_v2  }
  0x19   :  { %v170_v6 = vunpack.c.0.s8 %v169_v45 }
  0x1f   :  { %212 = vset.pattern.permute.xlu0 %v295_v0 }
  0x80   :  { %v59_v9 = vpop.permute.xlu0 %58 }
  0x81   :  { %v101_v13 = vpop.permute.xlu1 %100  ;;  %v75_v41 = vmul.f32 %v71_v14, %v59_v9  ;;  %v76_v42 = vmul.f32 %v72_v26, %v59_v9  ;;  %v77_v46 = vmul.f32 %v73_v27, %v59_v9  ;;  %v78_v47 = vmul.f32 %v74_v28, %v59_v9  ;;  %v167_v9 = vpop.permute.xlu2 %166  ;;  %v50_v14 = vld [vmem:[#allocation2] sm:$0xff] }
  0x82   :  { %v115_v48 = vmul.f32 %v111_v30, %v101_v13  ;;  %v116_v49 = vmul.f32 %v112_v31, %v101_v13  ;;  %v117_v56 = vmul.f32 %v113_v32, %v101_v13  ;;  %v118_v57 = vmul.f32 %v114_v37, %v101_v13 }
  0x83   :  { %v171_v16 = vperm.slane %v167_v9, %v170_v6 }
  0x89   :  { %v81_v50 = vpop.permute.xlu0 %80 }
  0x8a   :  { %v121_v51 = vpop.permute.xlu1 %120  ;;  %v95_v52 = vmul.f32 %v91_v33, %v81_v50  ;;  %v96_v53 = vmul.f32 %v92_v34, %v81_v50  ;;  %v97_v54 = vmul.f32 %v93_v35, %v81_v50  ;;  %v98_v55 = vmul.f32 %v94_v36, %v81_v50 }
  0x8b   :  { %v136_v58 = vmul.f32 %v132_v39, %v121_v51  ;;  %v138_v59 = vmul.f32 %v134_v40, %v121_v51  ;;  %v135_v0 = vmul.f32 %v131_v38, %v121_v51  ;;  %v137_v1 = vmul.f32 %v133_v43, %v121_v51 }
  0x8c   :  { %v139_v60 = vadd.f32 %v95_v52, %v75_v41  ;;  %v140_v61 = vadd.f32 %v96_v53, %v76_v42  ;;  %v141_v62 = vadd.f32 %v97_v54, %v77_v46  ;;  %v142_v63 = vadd.f32 %v98_v55, %v78_v47 }
  0x8e   :  { %v143_v2 = vadd.f32 %v139_v60, %v115_v48  ;;  %v144_v3 = vadd.f32 %v140_v61, %v116_v49  ;;  %v145_v4 = vadd.f32 %v141_v62, %v117_v56  ;;  %v146_v5 = vadd.f32 %v142_v63, %v118_v57 }
  0x90   :  { %v148_v7 = vadd.f32 %v144_v3, %v136_v58  ;;  %v150_v8 = vadd.f32 %v146_v5, %v138_v59  ;;  %v147_v10 = vadd.f32 %v143_v2, %v135_v0  ;;  %v149_v11 = vadd.f32 %v145_v4, %v137_v1 }
  0x92   :  { %v155_v12 = vrot.slane %v148_v7, 4  ;;  %v156_v13 = vrot.slane %v150_v8, 4 }
  0x94   :  { %v158_v17 = vsel %vm157_vm0, %v147_v10, %v155_v12  ;;  %v159_v18 = vsel %vm157_vm0, %v149_v11, %v156_v13 }
  0x95   :  { %v162_v19 = vadd.f32 %v158_v17, %v50_v14  ;;  %v163_v20 = vadd.f32 %v159_v18, %v51_v15 }
  0x97   :  { %v173_v21 = vadd.f32 %v171_v16, %v162_v19  ;;  %v174_v22 = vadd.f32 %v171_v16, %v163_v20 }
  0x99   :  { %175 = vst [vmem:[#allocation7] sm:$0xff] %v173_v21 }
  0x9a   :  { %176 = vst [vmem:[#allocation7 + $0x8] sm:$0xff] %v174_v22 }
  0x9b   :  { %189 = dma.vmem_to_hbm [thread:$0]  %s182_s3, 256, %s184_s5, [#allocation4], %s292_s23, %s292_s23, %s293_s24  }
  0x9c   :  { %289 = dma.done.wait [#allocation4], 256  }
  0x9d   :  { %290 = vsyncadd [#allocation4], 4294967040 }
  0x9e   :  { %194 = vsyncpa [#allocation3], 1 }
  0x9f   :  { %195 = vsyncpa [#allocation6], 1 }
  0xa0   :  { %196 = vsyncpa [#allocation4], 1 }

</bundles_post_ra>
